<compile_context>
chip_gen: v7x
topology: tpu7x:2x2x1
jax: 0.10.0
libtpu: 0.0.40
codegen_flags: <defaults>
</compile_context>

<pallas_src>
import functools

import jax
import jax.numpy as jnp
from jax.experimental import pallas as pl
from jax.experimental.pallas import tpu as pltpu

_BN_EPS = 1e-5
_LANES = 128


# ----------------------------------------------------------------------------- kernels


def _accum_lane_partials(r, s_acc, q_acc):
    """Accumulate sum(r) / sum(r*r) of r:(C_out, T) into (C_out, 128) lane partials.

    128-aligned static slices -> pure VPU adds on whole vregs; the single cross-lane
    reduction happens only once per batch-block when the partials are flushed.
    """
    c, t = r.shape
    n_full = t // _LANES
    for j in range(n_full):
        sl = r[:, j * _LANES:(j + 1) * _LANES]
        s_acc = s_acc + sl
        q_acc = q_acc + sl * sl
    rem = t - n_full * _LANES
    if rem:
        # Rare path: H*W not a multiple of 128 (block is then the full extent).
        tail = r[:, n_full * _LANES:]
        zpad = jnp.zeros((c, _LANES - 1), jnp.float32)
        s_acc = s_acc + jnp.concatenate(
            [jnp.sum(tail, axis=1, keepdims=True), zpad], axis=1)
        q_acc = q_acc + jnp.concatenate(
            [jnp.sum(tail * tail, axis=1, keepdims=True), zpad], axis=1)
    return s_acc, q_acc


def _bn_stats_kernel(s1_ref, wr_t_ref, out_ref, acc_ref, *, nb, precision):
    """Pass 1: per-batch-block partial BN stats of r = Wr^T @ relu(s1).

    grid = (batch-blocks ["parallel"], hw-tiles ["arbitrary"]).
    s1_ref  : (nb, C_in, hw_tile)   input tile (input dtype)
    wr_t_ref: (C_out, C_in)         resizing 1x1 conv weight (transposed)
    out_ref : (1, 2, C_out)         partial [sum; sum_sq] for this batch block
    acc_ref : (2, C_out, 128) f32   lane-parallel running partials (VMEM scratch)
    """
    t = pl.program_id(1)

    @pl.when(t == 0)
    def _():
        acc_ref[...] = jnp.zeros_like(acc_ref)

    wr_t = wr_t_ref[...]
    s_acc = acc_ref[0]
    q_acc = acc_ref[1]
    for b in range(nb):                                   # static unroll over batch block
        x = jnp.maximum(s1_ref[b], 0.0)                   # ReLU, stays in input dtype
        r = jnp.dot(wr_t, x, preferred_element_type=jnp.float32, precision=precision)
        s_acc, q_acc = _accum_lane_partials(r, s_acc, q_acc)
    acc_ref[0] = s_acc
    acc_ref[1] = q_acc

    @pl.when(t == pl.num_programs(1) - 1)
    def _():
        # One cross-lane reduce + one tiny store per batch block.
        out_ref[0] = jnp.sum(acc_ref[...], axis=-1)       # (2, C_out)


def _cell_main_kernel(s0_ref, s1_ref, wa_t_ref, wb_t_ref, wr_t_ref,
                      scale_ref, shift_ref, out_ref, *, nb, precision):
    """Pass 2: out = BN(conv_r(relu(s1))) + sigmoid(gate)*(w0*conv_a(s0)+w1*conv_b(s1)).

    sigmoid(gate)*mix-weights are pre-folded into wa_t/wb_t and BN scale/shift are
    precomputed, so each grid step is three lane-dense (C_out,C_in)@(C_in,T) matmuls
    plus a fused multiply-add.  grid = (batch-blocks, hw-tiles), both "parallel"
    (no cross-step state) so v7x megacore can shard the dominant pass.
    """
    scale = scale_ref[...]                                # (C_out, 1) f32
    shift = shift_ref[...]
    wa_t = wa_t_ref[...]
    wb_t = wb_t_ref[...]
    wr_t = wr_t_ref[...]
    for b in range(nb):                                   # static unroll over batch block
        s0 = s0_ref[b]                                    # (C_in, T), input dtype
        s1 = s1_ref[b]
        r = jnp.dot(wr_t, jnp.maximum(s1, 0.0),
                    preferred_element_type=jnp.float32, precision=precision)
        gated = (jnp.dot(wa_t, s0, preferred_element_type=jnp.float32, precision=precision)
                 + jnp.dot(wb_t, s1, preferred_element_type=jnp.float32, precision=precision))
        out_ref[b] = (scale * r + shift + gated).astype(out_ref.dtype)


# ------------------------------------------------------------------- planning / wrapper


def _tpu_budgets():
    """(vmem_budget_bytes, per_step_dma_target_bytes) for the current TPU generation."""
    kind = ""
    try:
        kind = jax.devices()[0].device_kind.lower()
    except Exception:
        pass
    try:
        vmem_cap = int(pltpu.get_tpu_info().vmem_capacity_bytes)
    except Exception:
        if "v7" in kind:
            vmem_cap = 64 << 20
        elif kind:
            vmem_cap = 128 << 20
        else:
            vmem_cap = 64 << 20       # unknown: be conservative
    vmem_budget = (vmem_cap * 3) // 4  # headroom for Mosaic internals / compiler scratch
    if "v7" in kind:
        step_target = 1 << 20          # ~3.2 TB/s HBM
    elif "v6" in kind or "trillium" in kind:
        step_target = 512 << 10        # ~1.4 TB/s HBM
    else:
        step_target = 320 << 10        # v5e (~0.8 TB/s) and unknown
    return vmem_budget, step_target


def _pick_tiles(n, hw, bytes_per_col, resident_bytes, vmem_budget, step_target):
    """Pick (batch_block, hw_tile).

    hw_tile: largest multiple of 128 dividing H*W (or the full extent) whose
    double-buffered blocks fit the VMEM budget.  batch_block is then grown until each
    grid step moves ~step_target bytes of HBM traffic (amortizing the ~0.35us/step
    pipeline overhead) while still fitting VMEM.  Counts ALL tiled operands.
    """
    hw_cands = [t for t in range(_LANES, hw + 1, _LANES) if hw % t == 0] or [hw]
    nb_cands = [b for b in range(1, n + 1) if n % b == 0]

    def vmem_need(nb, t):
        return 2 * nb * t * bytes_per_col + resident_bytes

    fitting = [t for t in hw_cands if vmem_need(1, t) <= vmem_budget]
    hw_tile = max(fitting) if fitting else hw_cands[0]
    nb = 1
    for b in nb_cands:
        if vmem_need(b, hw_tile) > vmem_budget:
            break
        nb = b
        if b * hw_tile * bytes_per_col >= step_target:
            break
    return nb, hw_tile


@functools.partial(jax.jit, static_argnames=("batch_block", "hw_tile", "vmem_limit"))
def _cell_forward_impl(s0_nchw, s1_nchw, weights, gate, wa, wb, wr, gamma, beta, *,
                       batch_block, hw_tile, vmem_limit):
    N, C_in, H, W = s0_nchw.shape
    C_out = wa.shape[1]
    HW = H * W
    nb = batch_block
    n_nb = N // nb
    n_t = HW // hw_tile
    in_dtype = s0_nchw.dtype
    precision = jax.lax.Precision.HIGHEST if in_dtype == jnp.float32 else None

    # NCHW is already channels-first: a free reshape gives lane-dense (N, C, H*W) slabs.
    s0 = s0_nchw.reshape(N, C_in, HW)
    s1 = s1_nchw.reshape(N, C_in, HW)

    # Grid-invariant work hoisted out of the kernels: fold sigmoid(gate)*mix-weights into
    # the tiny (C_out, C_in) matrices once; keep matmul operands in the input dtype.
    g = jax.nn.sigmoid(gate[0].astype(jnp.float32))
    wa_t = ((g * weights[0].astype(jnp.float32)) * wa.T.astype(jnp.float32)).astype(in_dtype)
    wb_t = ((g * weights[1].astype(jnp.float32)) * wb.T.astype(jnp.float32)).astype(in_dtype)
    wr_t = wr.T.astype(in_dtype)

    # ---- pass 1: BN statistics (reads only s1) --------------------------------------
    stats = pl.pallas_call(
        functools.partial(_bn_stats_kernel, nb=nb, precision=precision),
        out_shape=jax.ShapeDtypeStruct((n_nb, 2, C_out), jnp.float32),
        grid_spec=pltpu.PrefetchScalarGridSpec(
            num_scalar_prefetch=0,
            grid=(n_nb, n_t),
            in_specs=[
                pl.BlockSpec((nb, C_in, hw_tile), lambda i, t: (i, 0, t)),
                pl.BlockSpec((C_out, C_in), lambda i, t: (0, 0)),
            ],
            out_specs=pl.BlockSpec((1, 2, C_out), lambda i, t: (i, 0, 0)),
            scratch_shapes=[pltpu.VMEM((2, C_out, _LANES), jnp.float32)],
        ),
        compiler_params=pltpu.CompilerParams(
            dimension_semantics=("parallel", "arbitrary"),
            vmem_limit_bytes=vmem_limit),
    )(s1, wr_t)

    # ---- tiny XLA glue: global training-mode (biased) BN stats -> scale/shift --------
    count = jnp.float32(N * HW)
    totals = jnp.sum(stats, axis=0)                       # (2, C_out)
    mean = totals[0] / count
    var = jnp.maximum(totals[1] / count - mean * mean, 0.0)
    scale = gamma.reshape(C_out).astype(jnp.float32) * jax.lax.rsqrt(var + _BN_EPS)
    shift = beta.reshape(C_out).astype(jnp.float32) - scale * mean
    scale = scale.reshape(C_out, 1)
    shift = shift.reshape(C_out, 1)

    # ---- pass 2: normalize + gated mixture (dominant pass, fully parallel grid) ------
    out = pl.pallas_call(
        functools.partial(_cell_main_kernel, nb=nb, precision=precision),
        out_shape=jax.ShapeDtypeStruct((N, C_out, HW), in_dtype),
        grid_spec=pltpu.PrefetchScalarGridSpec(
            num_scalar_prefetch=0,
            grid=(n_nb, n_t),
            in_specs=[
                pl.BlockSpec((nb, C_in, hw_tile), lambda i, t: (i, 0, t)),   # s0
                pl.BlockSpec((nb, C_in, hw_tile), lambda i, t: (i, 0, t)),   # s1
                pl.BlockSpec((C_out, C_in), lambda i, t: (0, 0)),            # wa_t
                pl.BlockSpec((C_out, C_in), lambda i, t: (0, 0)),            # wb_t
                pl.BlockSpec((C_out, C_in), lambda i, t: (0, 0)),            # wr_t
                pl.BlockSpec((C_out, 1), lambda i, t: (0, 0)),               # scale
                pl.BlockSpec((C_out, 1), lambda i, t: (0, 0)),               # shift
            ],
            out_specs=pl.BlockSpec((nb, C_out, hw_tile), lambda i, t: (i, 0, t)),
        ),
        compiler_params=pltpu.CompilerParams(
            dimension_semantics=("parallel", "parallel"),   # no cross-step state
            vmem_limit_bytes=vmem_limit),
    )(s0, s1, wa_t, wb_t, wr_t, scale, shift)

    return out.reshape(N, C_out, H, W)


def cell_forward(s0_nchw, s1_nchw, weights, gate, wa, wb, wr, gamma, beta, *,
                 batch_block=None, hw_tile=None):
    """s0/s1: (N, C_in, H, W). Returns (N, C_out, H, W). Matmuls in input dtype, BN in f32."""
    N, C_in, H, W = s0_nchw.shape
    C_out = wa.shape[1]
    HW = H * W
    itemsize = jnp.dtype(s0_nchw.dtype).itemsize

    vmem_budget, step_target = _tpu_budgets()
    # Per-step HBM traffic counts ALL tiled operands of the main pass: s0 + s1 in, out.
    bytes_per_col = (2 * C_in + C_out) * itemsize
    resident = (3 * C_in * C_out) * itemsize + (2 * C_out) * 4 \
        + (2 * C_out * _LANES) * 4 + (64 << 10)

    if batch_block is None or hw_tile is None:
        nb_auto, hw_auto = _pick_tiles(N, HW, bytes_per_col, resident,
                                       vmem_budget, step_target)
        batch_block = batch_block if batch_block is not None else nb_auto
        hw_tile = hw_tile if hw_tile is not None else hw_auto
    assert N % batch_block == 0, "batch_block must divide N"
    assert HW % hw_tile == 0, "hw_tile must divide H*W (keeps BN stats exact)"

    need = 2 * batch_block * hw_tile * bytes_per_col + resident
    vmem_limit = int(min(max(2 * need, 8 << 20), vmem_budget))
    vmem_limit = max(vmem_limit, need + (1 << 20))   # never clamp below the real need

    return _cell_forward_impl(
        s0_nchw, s1_nchw, weights, gate, wa, wb, wr, gamma, beta,
        batch_block=int(batch_block), hw_tile=int(hw_tile), vmem_limit=int(vmem_limit))


# ----------------------------------------------------------------------------- reference


def _reference_forward(s0, s1, weights, gate, wa, wb, wr, gamma, beta):
    """Pure-JAX reference mirroring the PyTorch module (training-mode BN)."""
    hp = jax.lax.Precision.HIGHEST
    N, C_in, H, W = s0.shape
    C_out = wa.shape[1]
    s0r = jnp.transpose(s0, (0, 2, 3, 1)).reshape(-1, C_in)
    s1r = jnp.transpose(s1, (0, 2, 3, 1)).reshape(-1, C_in)
    cell_out = (weights[0] * jnp.dot(s0r, wa, precision=hp)
                + weights[1] * jnp.dot(s1r, wb, precision=hp))
    gated = jax.nn.sigmoid(gate[0]) * cell_out
    r = jnp.dot(jnp.maximum(s1r, 0.0), wr, precision=hp)
    mean = jnp.mean(r, axis=0, keepdims=True)
    var = jnp.mean((r - mean) ** 2, axis=0, keepdims=True)
    r_bn = gamma * (r - mean) / jnp.sqrt(var + _BN_EPS) + beta
    out = (r_bn + gated).reshape(N, H, W, C_out)
    return jnp.transpose(out, (0, 3, 1, 2))


if __name__ == "__main__":
    key = jax.random.PRNGKey(0)
    k_s0, k_s1, k_w, k_g, k_a, k_b, k_r = jax.random.split(key, 7)

    N, C_in, C_out, H, W = 2, 4, 8, 16, 16

    s0 = jax.random.normal(k_s0, (N, C_in, H, W), jnp.float32)
    s1 = jax.random.normal(k_s1, (N, C_in, H, W), jnp.float32)
    weights = jax.nn.softmax(jax.random.normal(k_w, (2,), jnp.float32))

    gate = 0.001 * jax.random.normal(k_g, (1,), jnp.float32)          # nn.Parameter(0.001*randn(1))
    wa = 0.1 * jax.random.normal(k_a, (C_in, C_out), jnp.float32)     # cell conv1x1 (s0 branch)
    wb = 0.1 * jax.random.normal(k_b, (C_in, C_out), jnp.float32)     # cell conv1x1 (s1 branch)
    wr = 0.1 * jax.random.normal(k_r, (C_in, C_out), jnp.float32)     # resizing conv1x1 (no bias)
    gamma = jnp.ones((1, C_out), jnp.float32)                         # BatchNorm2d affine weight
    beta = jnp.zeros((1, C_out), jnp.float32)                         # BatchNorm2d affine bias

    ref = _reference_forward(s0, s1, weights, gate, wa, wb, wr, gamma, beta)

    # Explicitly tiled path: grid (2 batch-blocks, 2 hw-tiles) exercises multi-tile
    # partial-stats accumulation + the XLA reduction of per-block partials.
    out_tiled = jax.block_until_ready(
        cell_forward(s0, s1, weights, gate, wa, wb, wr, gamma, beta,
                     batch_block=1, hw_tile=128))
    assert out_tiled.shape == (N, C_out, H, W)
    assert jnp.allclose(out_tiled, ref, atol=1e-3, rtol=1e-3), "tiled mismatch vs. reference"

    # Auto-tiled path (generation-aware tile/VMEM picker).
    out_auto = jax.block_until_ready(
        cell_forward(s0, s1, weights, gate, wa, wb, wr, gamma, beta))
    assert jnp.allclose(out_auto, ref, atol=1e-3, rtol=1e-3), "auto-tile mismatch vs. reference"

    print("KERNEL_OK")
</pallas_src>

<mosaic_0001>
module attributes {stable_mosaic.version = 11 : i64} {
  func.func @_bn_stats_kernel(%arg0: i32, %arg1: i32, %arg2: memref<1x4x128xf32, #tpu.memory_space<vmem>>, %arg3: memref<8x4xf32, #tpu.memory_space<vmem>>, %arg4: memref<1x2x8xf32, #tpu.memory_space<vmem>>, %arg5: memref<2x8x128xf32, #tpu.memory_space<vmem>>) attributes {dimension_semantics = [#tpu.dimension_semantics<parallel>, #tpu.dimension_semantics<arbitrary>], iteration_bounds = array<i64: 2, 2>, scalar_prefetch = 0 : i64, scratch_operands = 1 : i64, tpu.core_type = #tpu.core_type<tc>, window_params = [{transform_indices = @transform_0, window_bounds = array<i64: 1, 4, 128>}, {pipeline_mode = #tpu.pipeline_mode<synchronous>, transform_indices = @transform_1, window_bounds = array<i64: 8, 4>}, {transform_indices = @transform_2, window_bounds = array<i64: 1, 2, 8>}]} {
    %c0_i32 = arith.constant 0 : i32
    %0 = arith.cmpi eq, %arg1, %c0_i32 : i32
    %1 = arith.extui %0 : i1 to i32
    %c0_i32_0 = arith.constant 0 : i32
    %2 = arith.cmpi ne, %1, %c0_i32_0 : i32
    scf.if %2 {
      %cst_18 = arith.constant 0.000000e+00 : f32
      %25 = vector.broadcast %cst_18 : f32 to vector<2x8x128xf32>
      %c0_19 = arith.constant 0 : index
      %c0_20 = arith.constant 0 : index
      %c0_21 = arith.constant 0 : index
      %26 = vector.load %arg5[%c0_19, %c0_20, %c0_21] : memref<2x8x128xf32, #tpu.memory_space<vmem>>, vector<2x8x128xf32>
      tpu.vector_store %arg5[%c0_19, %c0_20, %c0_21], %25 {strides = array<i32>} : memref<2x8x128xf32, #tpu.memory_space<vmem>>, vector<2x8x128xf32>,
    } else {
    }
    %c0 = arith.constant 0 : index
    %c0_1 = arith.constant 0 : index
    %3 = vector.load %arg3[%c0, %c0_1] : memref<8x4xf32, #tpu.memory_space<vmem>>, vector<8x4xf32>
    %c0_2 = arith.constant 0 : index
    %c0_3 = arith.constant 0 : index
    %c0_4 = arith.constant 0 : index
    %4 = vector.load %arg5[%c0_2, %c0_3, %c0_4] : memref<2x8x128xf32, #tpu.memory_space<vmem>>, vector<1x8x128xf32>
    %5 = vector.shape_cast %4 : vector<1x8x128xf32> to vector<8x128xf32>
    %c1 = arith.constant 1 : index
    %c0_5 = arith.constant 0 : index
    %c0_6 = arith.constant 0 : index
    %6 = vector.load %arg5[%c1, %c0_5, %c0_6] : memref<2x8x128xf32, #tpu.memory_space<vmem>>, vector<1x8x128xf32>
    %7 = vector.shape_cast %6 : vector<1x8x128xf32> to vector<8x128xf32>
    %c0_7 = arith.constant 0 : index
    %c0_8 = arith.constant 0 : index
    %c0_9 = arith.constant 0 : index
    %8 = vector.load %arg2[%c0_7, %c0_8, %c0_9] : memref<1x4x128xf32, #tpu.memory_space<vmem>>, vector<1x4x128xf32>
    %9 = vector.shape_cast %8 : vector<1x4x128xf32> to vector<4x128xf32>
    %cst = arith.constant 0.000000e+00 : f32
    %10 = vector.broadcast %cst : f32 to vector<4x128xf32>
    %11 = arith.maximumf %9, %10 : vector<4x128xf32>
    %cst_10 = arith.constant dense<0.000000e+00> : vector<8x128xf32>
    %12 = tpu.matmul %3, %11, %cst_10 {dimension_numbers = #tpu.dot_dimension_numbers<[1], [0], [0], [1], [0, 0, 1, 1], [], []>, precision = #tpu.contract_precision<fp32>} : vector<8x4xf32>, vector<4x128xf32>, vector<8x128xf32> -> vector<8x128xf32>
    %13 = arith.addf %5, %12 : vector<8x128xf32>
    %14 = arith.mulf %12, %12 : vector<8x128xf32>
    %15 = arith.addf %7, %14 : vector<8x128xf32>
    %c0_11 = arith.constant 0 : index
    %c0_12 = arith.constant 0 : index
    %c0_13 = arith.constant 0 : index
    %16 = vector.load %arg5[%c0_11, %c0_12, %c0_13] : memref<2x8x128xf32, #tpu.memory_space<vmem>>, vector<1x8x128xf32>
    %17 = vector.shape_cast %16 : vector<1x8x128xf32> to vector<8x128xf32>
    %18 = vector.shape_cast %13 : vector<8x128xf32> to vector<1x8x128xf32>
    tpu.vector_store %arg5[%c0_11, %c0_12, %c0_13], %18 {strides = array<i32>} : memref<2x8x128xf32, #tpu.memory_space<vmem>>, vector<1x8x128xf32>,
    %c1_14 = arith.constant 1 : index
    %c0_15 = arith.constant 0 : index
    %c0_16 = arith.constant 0 : index
    %19 = vector.load %arg5[%c1_14, %c0_15, %c0_16] : memref<2x8x128xf32, #tpu.memory_space<vmem>>, vector<1x8x128xf32>
    %20 = vector.shape_cast %19 : vector<1x8x128xf32> to vector<8x128xf32>
    %21 = vector.shape_cast %15 : vector<8x128xf32> to vector<1x8x128xf32>
    tpu.vector_store %arg5[%c1_14, %c0_15, %c0_16], %21 {strides = array<i32>} : memref<2x8x128xf32, #tpu.memory_space<vmem>>, vector<1x8x128xf32>,
    %c1_i32 = arith.constant 1 : i32
    %22 = arith.cmpi eq, %arg1, %c1_i32 : i32
    %23 = arith.extui %22 : i1 to i32
    %c0_i32_17 = arith.constant 0 : i32
    %24 = arith.cmpi ne, %23, %c0_i32_17 : i32
    scf.if %24 {
      %c0_18 = arith.constant 0 : index
      %c0_19 = arith.constant 0 : index
      %c0_20 = arith.constant 0 : index
      %25 = vector.load %arg5[%c0_18, %c0_19, %c0_20] : memref<2x8x128xf32, #tpu.memory_space<vmem>>, vector<2x8x128xf32>
      %cst_21 = arith.constant dense<0.000000e+00> : vector<2x8xf32>
      %26 = vector.multi_reduction <add>, %25, %cst_21 [2] : vector<2x8x128xf32> to vector<2x8xf32>
      %c0_22 = arith.constant 0 : index
      %c0_23 = arith.constant 0 : index
      %c0_24 = arith.constant 0 : index
      %27 = vector.load %arg4[%c0_22, %c0_23, %c0_24] : memref<1x2x8xf32, #tpu.memory_space<vmem>>, vector<1x2x8xf32>
      %28 = vector.shape_cast %27 : vector<1x2x8xf32> to vector<2x8xf32>
      %29 = vector.shape_cast %26 : vector<2x8xf32> to vector<1x2x8xf32>
      tpu.vector_store %arg4[%c0_22, %c0_23, %c0_24], %29 {strides = array<i32>} : memref<1x2x8xf32, #tpu.memory_space<vmem>>, vector<1x2x8xf32>,
    } else {
    }
    return
  }
  func.func @transform_0(%arg0: i32, %arg1: i32) -> (i32, i32, i32) {
    %c0_i32 = arith.constant 0 : i32
    %c0_i32_0 = arith.constant 0 : i32
    return %arg0, %c0_i32, %arg1 : i32, i32, i32
  }
  func.func @transform_1(%arg0: i32, %arg1: i32) -> (i32, i32) {
    %c0_i32 = arith.constant 0 : i32
    %c0_i32_0 = arith.constant 0 : i32
    %c0_i32_1 = arith.constant 0 : i32
    return %c0_i32, %c0_i32_0 : i32, i32
  }
  func.func @transform_2(%arg0: i32, %arg1: i32) -> (i32, i32, i32) {
    %c0_i32 = arith.constant 0 : i32
    %c0_i32_0 = arith.constant 0 : i32
    %c0_i32_1 = arith.constant 0 : i32
    return %arg0, %c0_i32, %c0_i32_0 : i32, i32, i32
  }
}

module attributes {stable_mosaic.version = 11 : i64} {
  func.func @_cell_main_kernel(%arg0: i32, %arg1: i32, %arg2: memref<1x4x128xf32, #tpu.memory_space<vmem>>, %arg3: memref<1x4x128xf32, #tpu.memory_space<vmem>>, %arg4: memref<8x4xf32, #tpu.memory_space<vmem>>, %arg5: memref<8x4xf32, #tpu.memory_space<vmem>>, %arg6: memref<8x4xf32, #tpu.memory_space<vmem>>, %arg7: memref<8x1xf32, #tpu.memory_space<vmem>>, %arg8: memref<8x1xf32, #tpu.memory_space<vmem>>, %arg9: memref<1x8x128xf32, #tpu.memory_space<vmem>>) attributes {dimension_semantics = [#tpu.dimension_semantics<parallel>, #tpu.dimension_semantics<parallel>], iteration_bounds = array<i64: 2, 2>, scalar_prefetch = 0 : i64, scratch_operands = 0 : i64, tpu.core_type = #tpu.core_type<tc>, window_params = [{transform_indices = @transform_0, window_bounds = array<i64: 1, 4, 128>}, {transform_indices = @transform_1, window_bounds = array<i64: 1, 4, 128>}, {pipeline_mode = #tpu.pipeline_mode<synchronous>, transform_indices = @transform_2, window_bounds = array<i64: 8, 4>}, {pipeline_mode = #tpu.pipeline_mode<synchronous>, transform_indices = @transform_3, window_bounds = array<i64: 8, 4>}, {pipeline_mode = #tpu.pipeline_mode<synchronous>, transform_indices = @transform_4, window_bounds = array<i64: 8, 4>}, {pipeline_mode = #tpu.pipeline_mode<synchronous>, transform_indices = @transform_5, window_bounds = array<i64: 8, 1>}, {pipeline_mode = #tpu.pipeline_mode<synchronous>, transform_indices = @transform_6, window_bounds = array<i64: 8, 1>}, {transform_indices = @transform_7, window_bounds = array<i64: 1, 8, 128>}]} {
    %c0 = arith.constant 0 : index
    %c0_0 = arith.constant 0 : index
    %0 = vector.load %arg7[%c0, %c0_0] : memref<8x1xf32, #tpu.memory_space<vmem>>, vector<8x1xf32>
    %c0_1 = arith.constant 0 : index
    %c0_2 = arith.constant 0 : index
    %1 = vector.load %arg8[%c0_1, %c0_2] : memref<8x1xf32, #tpu.memory_space<vmem>>, vector<8x1xf32>
    %c0_3 = arith.constant 0 : index
    %c0_4 = arith.constant 0 : index
    %2 = vector.load %arg4[%c0_3, %c0_4] : memref<8x4xf32, #tpu.memory_space<vmem>>, vector<8x4xf32>
    %c0_5 = arith.constant 0 : index
    %c0_6 = arith.constant 0 : index
    %3 = vector.load %arg5[%c0_5, %c0_6] : memref<8x4xf32, #tpu.memory_space<vmem>>, vector<8x4xf32>
    %c0_7 = arith.constant 0 : index
    %c0_8 = arith.constant 0 : index
    %4 = vector.load %arg6[%c0_7, %c0_8] : memref<8x4xf32, #tpu.memory_space<vmem>>, vector<8x4xf32>
    %c0_9 = arith.constant 0 : index
    %c0_10 = arith.constant 0 : index
    %c0_11 = arith.constant 0 : index
    %5 = vector.load %arg2[%c0_9, %c0_10, %c0_11] : memref<1x4x128xf32, #tpu.memory_space<vmem>>, vector<1x4x128xf32>
    %6 = vector.shape_cast %5 : vector<1x4x128xf32> to vector<4x128xf32>
    %c0_12 = arith.constant 0 : index
    %c0_13 = arith.constant 0 : index
    %c0_14 = arith.constant 0 : index
    %7 = vector.load %arg3[%c0_12, %c0_13, %c0_14] : memref<1x4x128xf32, #tpu.memory_space<vmem>>, vector<1x4x128xf32>
    %8 = vector.shape_cast %7 : vector<1x4x128xf32> to vector<4x128xf32>
    %cst = arith.constant 0.000000e+00 : f32
    %9 = vector.broadcast %cst : f32 to vector<4x128xf32>
    %10 = arith.maximumf %8, %9 : vector<4x128xf32>
    %cst_15 = arith.constant dense<0.000000e+00> : vector<8x128xf32>
    %11 = tpu.matmul %4, %10, %cst_15 {dimension_numbers = #tpu.dot_dimension_numbers<[1], [0], [0], [1], [0, 0, 1, 1], [], []>, precision = #tpu.contract_precision<fp32>} : vector<8x4xf32>, vector<4x128xf32>, vector<8x128xf32> -> vector<8x128xf32>
    %cst_16 = arith.constant dense<0.000000e+00> : vector<8x128xf32>
    %12 = tpu.matmul %2, %6, %cst_16 {dimension_numbers = #tpu.dot_dimension_numbers<[1], [0], [0], [1], [0, 0, 1, 1], [], []>, precision = #tpu.contract_precision<fp32>} : vector<8x4xf32>, vector<4x128xf32>, vector<8x128xf32> -> vector<8x128xf32>
    %cst_17 = arith.constant dense<0.000000e+00> : vector<8x128xf32>
    %13 = tpu.matmul %3, %8, %cst_17 {dimension_numbers = #tpu.dot_dimension_numbers<[1], [0], [0], [1], [0, 0, 1, 1], [], []>, precision = #tpu.contract_precision<fp32>} : vector<8x4xf32>, vector<4x128xf32>, vector<8x128xf32> -> vector<8x128xf32>
    %14 = arith.addf %12, %13 : vector<8x128xf32>
    %15 = vector.broadcast %0 : vector<8x1xf32> to vector<8x128xf32>
    %16 = arith.mulf %15, %11 : vector<8x128xf32>
    %17 = vector.broadcast %1 : vector<8x1xf32> to vector<8x128xf32>
    %18 = arith.addf %16, %17 : vector<8x128xf32>
    %19 = arith.addf %18, %14 : vector<8x128xf32>
    %c0_18 = arith.constant 0 : index
    %c0_19 = arith.constant 0 : index
    %c0_20 = arith.constant 0 : index
    %20 = vector.load %arg9[%c0_18, %c0_19, %c0_20] : memref<1x8x128xf32, #tpu.memory_space<vmem>>, vector<1x8x128xf32>
    %21 = vector.shape_cast %20 : vector<1x8x128xf32> to vector<8x128xf32>
    %22 = vector.shape_cast %19 : vector<8x128xf32> to vector<1x8x128xf32>
    tpu.vector_store %arg9[%c0_18, %c0_19, %c0_20], %22 {strides = array<i32>} : memref<1x8x128xf32, #tpu.memory_space<vmem>>, vector<1x8x128xf32>,
    return
  }
  func.func @transform_0(%arg0: i32, %arg1: i32) -> (i32, i32, i32) {
    %c0_i32 = arith.constant 0 : i32
    %c0_i32_0 = arith.constant 0 : i32
    return %arg0, %c0_i32, %arg1 : i32, i32, i32
  }
  func.func @transform_1(%arg0: i32, %arg1: i32) -> (i32, i32, i32) {
    %c0_i32 = arith.constant 0 : i32
    %c0_i32_0 = arith.constant 0 : i32
    return %arg0, %c0_i32, %arg1 : i32, i32, i32
  }
  func.func @transform_2(%arg0: i32, %arg1: i32) -> (i32, i32) {
    %c0_i32 = arith.constant 0 : i32
    %c0_i32_0 = arith.constant 0 : i32
    %c0_i32_1 = arith.constant 0 : i32
    return %c0_i32, %c0_i32_0 : i32, i32
  }
  func.func @transform_3(%arg0: i32, %arg1: i32) -> (i32, i32) {
    %c0_i32 = arith.constant 0 : i32
    %c0_i32_0 = arith.constant 0 : i32
    %c0_i32_1 = arith.constant 0 : i32
    return %c0_i32, %c0_i32_0 : i32, i32
  }
  func.func @transform_4(%arg0: i32, %arg1: i32) -> (i32, i32) {
    %c0_i32 = arith.constant 0 : i32
    %c0_i32_0 = arith.constant 0 : i32
    %c0_i32_1 = arith.constant 0 : i32
    return %c0_i32, %c0_i32_0 : i32, i32
  }
  func.func @transform_5(%arg0: i32, %arg1: i32) -> (i32, i32) {
    %c0_i32 = arith.constant 0 : i32
    %c0_i32_0 = arith.constant 0 : i32
    %c0_i32_1 = arith.constant 0 : i32
    return %c0_i32, %c0_i32_0 : i32, i32
  }
  func.func @transform_6(%arg0: i32, %arg1: i32) -> (i32, i32) {
    %c0_i32 = arith.constant 0 : i32
    %c0_i32_0 = arith.constant 0 : i32
    %c0_i32_1 = arith.constant 0 : i32
    return %c0_i32, %c0_i32_0 : i32, i32
  }
  func.func @transform_7(%arg0: i32, %arg1: i32) -> (i32, i32, i32) {
    %c0_i32 = arith.constant 0 : i32
    %c0_i32_0 = arith.constant 0 : i32
    return %arg0, %c0_i32, %arg1 : i32, i32, i32
  }
}

</mosaic_0001>

<bundles_post_ra>
// kernel: _cell_forward_impl.2
= control target key start
LH: loop header
LB: loop body
LE: loop exit
PB: predicated region body
PF: predicated region fallthrough
CT: control target
= control target key end

     0   :  { %s897_s9 = smov 0   ;;  %s899_s10 = smov 0   ;;  %s966_s0 = inlined_call_operand.vmem [shape: f32[2,4,256], index: 0, kind: input, shape index: {}]   ;;  %s967_s1 = inlined_call_operand.vmem [shape: f32[8,4], index: 1, kind: input, shape index: {}]   ;;  %s968_s2 = inlined_call_operand.vmem [shape: f32[2,2,8], index: 2, kind: output, shape index: {}]  }
   0x1   :  { %s901_s11 = smov 0   ;;  %s903_s12 = smov 0  }
   0x2   :  { %s905_s13 = smov 0  }
   0x3 LB: > { %s21_s14 = sadd.s32 1, %s869_s11  ;;  %s24_s15 = sadd.s32 1, %s873_s12  ;;  %s877_s13 = sphi %s905_s13, %s12_s13   ;;  %s873_s12 = sphi %s903_s12, %s972_s12   ;;  %s869_s11 = sphi %s901_s11, %s971_s11   ;;  %s865_s10 = sphi %s899_s10, %s970_s10   ;;  %s861_s9 = sphi %s897_s9, %s969_s9  }
   0x4   : > { %p22_p0 = scmp.ge.s32.totalorder %s21_s14, 2  ;;  %p737_p1 = scmp.ge.s32.totalorder %s877_s13, 1 }
   0x5   : > { %p129_p2 = scmp.lt.s32.totalorder %s877_s13, 5 }
   0x6   : > { %s974_s14 = smov (%p22_p0, %s21_s14), 0  ;;  %s976_s15 = smov (!%p22_p0, %s24_s15), %s873_s12 }
   0x7   : > { %p130_p3 = pnand %p737_p1, %p129_p2  ;;  %p26_p4 = scmp.ge.s32.totalorder %s976_s15, 2 }
   0x8   : > { %p153_p5 = scmp.lt.s32.totalorder (!%p130_p3), %s865_s10, 1  ;;  %p155_p6 = scmp.lt.s32.totalorder (!%p130_p3), %s861_s9, 1 }
   0x9   : > { %s978_s15 = smov (%p26_p4, %s976_s15), 0  ;;  %133 = sbr.rel (%p130_p3) target bundleno = 426 (0x1aa), region = 28 }
   0xa   : > { %p741_p7 = scmp.ne.s32.totalorder (!%p130_p3), %s861_s9, 0 }
  0x10   : > { %s980_s10 = smov (!%p153_p5, %s865_s10), 1  ;;  %168 = sbr.rel (%p741_p7) target bundleno = 23 (0x17), region = 32 }
  0x11   : > { %s156_s16 = scalar_select %p155_p6, %s861_s9, 1 }
  0x12   : > { %s738_s17 = sshll.u32 %s980_s10, 1  ;;  %v879_v0 = vmov (!%p741_p7), 0.0  }
  0x13   : > { %s158_s18 = sadd.s32 %s738_s17, %s156_s16  ;;  %s934_s21 = scalar_lea.vmem %s968_s2, %s738_s17  ;;  %169 = vst [vmem:[#allocation2] sm:$0xff] (!%p741_p7), %v879_v0  ;;  %170 = vst [vmem:[#allocation2 + $0x8] sm:$0xff] (!%p741_p7), %v879_v0 }
  0x14   : > { %s739_s22 = sshll.u32 %s158_s18, 2 }
  0x15   : > { %s160_s25 = scalar_lea.vmem %s966_s0, %s739_s22 }
  0x17 PF: > { %v175_v1 = vld [vmem:[%s160_s25] sm:$0xf]  ;;  %vm181_vm0 = vcmask 1043456   ;;  %v880_v3 = vmov 0.0   ;;  %vm881_vm1 = vmmov 0   ;;  %vm177_vm2 = vcmask 31744  }
  0x18   : > { %v171_v2 = vld [vmem:[%s967_s1] sm:$0xff]  ;;  %772 = vmatprep.subr.mxu0 %v880_v3  ;;  %v176_v4 = vmax.f32 %v175_v1, 0.0  ;;  %774 = vmatprep.mubr.msk.f32.mxu0 %vm881_vm1, %v880_v3  ;;  %p742_p8 = scmp.ne.s32.totalorder %s861_s9, 1 }
  0x19   : > { %v179_v5 = vsel %vm177_vm2, %v171_v2, 0  ;;  %757 = vmatprep.subr.mxu1 %v880_v3  ;;  %759 = vmatprep.mubr.msk.f32.mxu1 %vm881_vm1, %v880_v3  ;;  %v648_v29 = vlaneseq (!%p742_p8)  ;;  %vm658_vm3 = vcmask (!%p742_p8), 1041409   ;;  %vm661_vm4 = vcmask (!%p742_p8), 58368  }
  0x1a   : > { %v183_v6 = vsel %vm181_vm0, %v176_v4, 0  ;;  %v251_v7 = vand.u32 4294901760, %v179_v5  ;;  %v172_v19 = vld [vmem:[#allocation2] sm:$0xff]  ;;  %v174_v23 = vld [vmem:[#allocation2 + $0x8] sm:$0xff] }
  0x1b   : > { %v186_v8 = vand.u32 4294901760, %v183_v6  ;;  %v649_v30 = vand.u32 (!%p742_p8), 127, %v648_v29  ;;  %v651_v31 = vshrl.u32 (!%p742_p8), %v648_v29, 7 }
  0x1c   : > { %v252_v9 = vsub.f32 %v179_v5, %v251_v7 }
  0x1d   : > { %v263_v10 = vsub.f32 %v183_v6, %v186_v8  ;;  %773 = vmatpush3.msra.mxu0 %v186_v8  ;;  %758 = vmatpush3.msra.mxu1 %v186_v8  ;;  %v652_v33 = vsub.s32 (!%p742_p8), %v649_v30, %v651_v31 }
  0x1e   : > { %v253_v11 = vand.u32 4294901760, %v252_v9  ;;  %762 = vmatprep.subr.mxu1 %v880_v3  ;;  %777 = vmatprep.subr.mxu0 %v880_v3 }
  0x1f   : > { %v264_v12 = vand.u32 4294901760, %v263_v10 }
  0x20   : > { %775 = vmatmul.mubr.f32.vlgmr.msra.gmra.mrb[0].mxu0 %v253_v11  ;;  %v254_v13 = vsub.f32 %v252_v9, %v253_v11 }
  0x21   : > { %v265_v14 = vsub.f32 %v263_v10, %v264_v12  ;;  %778 = vmatpush3.msra.mxu0 %v264_v12  ;;  %779 = vmatprep.mubr.msk.f32.mxu0 %vm881_vm1, %v880_v3 }
  0x22   : > { %v255_v15 = vand.u32 4294901760, %v254_v13  ;;  %782 = vmatprep.subr.mxu0 %v880_v3 }
  0x23   : > { %v266_v16 = vand.u32 4294901760, %v265_v14 }
  0x24   : > { %760 = vmatmul.mubr.f32.vlgmr.msra.gmra.mrb[0].mxu1 %v255_v15 }
  0x25   : > { %763 = vmatpush3.msra.mxu1 %v266_v16  ;;  %764 = vmatprep.mubr.msk.f32.mxu1 %vm881_vm1, %v880_v3 }
  0x26   : > { %767 = vmatprep.subr.mxu1 %v880_v3 }
  0x28   : > { %780 = vmatmul.mubr.f32.vlgmr.msra.gmra.mrb[0].mxu0 %v251_v7 }
  0x29   : > { %783 = vmatpush3.msra.mxu0 %v186_v8  ;;  %784 = vmatprep.mubr.msk.f32.mxu0 %vm881_vm1, %v880_v3 }
  0x2c   : > { %765 = vmatmul.mubr.f32.vlgmr.msra.gmra.mrb[0].mxu1 %v251_v7 }
  0x2d   : > { %768 = vmatpush3.msra.mxu1 %v263_v10  ;;  %769 = vmatprep.mubr.msk.f32.mxu1 %vm881_vm1, %v880_v3 }
  0x30   : > { %785 = vmatmul.mubr.f32.vlgmr.msra.gmra.mrb[0].mxu0 %v251_v7 }
  0x34   : > { %770 = vmatmul.mubr.f32.vlgmr.msra.gmra.mrb[0].mxu1 %v252_v9 }
 0x103   : > { %v627_v17 = vpop.f32.mrb[0].mxu0 }
 0x104   : > { %v786_v18 = vpop.f32.mrb[1].mxu0 }
 0x107   : > { %v407_v20 = vpop.f32.mrb[0].mxu1 }
 0x108   : > { %v787_v21 = vadd.f32 %v627_v17, %v407_v20  ;;  %v771_v22 = vpop.f32.mrb[1].mxu1  ;;  %639 = sbr.rel (%p742_p8) target bundleno = 426 (0x1aa), region = 36 }
 0x10a   : > { %v631_v24 = vadd.f32 %v787_v21, %v172_v19  ;;  %v632_v25 = vmul.f32 %v787_v21, %v787_v21 }
 0x10c   : > { %v633_v26 = vadd.f32 %v632_v25, %v174_v23  ;;  %634 = vst [vmem:[#allocation2] sm:$0xff] %v631_v24 }
 0x10e   : > { %635 = vst [vmem:[#allocation2 + $0x8] sm:$0xff] %v633_v26 }
 0x113   : > { %v640_v27 = vld [vmem:[#allocation2] sm:$0xff] }
 0x114   : > { %642 = vadd.xlane.f32.xlu0 %v640_v27 }
 0x115   : > { %v641_v28 = vld [vmem:[#allocation2 + $0x8] sm:$0xff] }
 0x118   : > { %644 = vadd.xlane.f32.xlu0 %v641_v28 }
 0x1a1   : > { %v643_v32 = vpop.xlane.xlu0 %642 }
 0x1a2   : > { %v653_v35 = vrot.slane %v643_v32, %v652_v33 }
 0x1a5   : > { %v645_v34 = vpop.xlane.xlu0 %644 }
 0x1a6   : > { %v657_v36 = vrot.slane %v645_v34, %v652_v33 }
 0x1a8   : > { %v659_v37 = vsel %vm658_vm3, %v657_v36, %v653_v35 }
 0x1a9   : > { %662 = vst.msk [vmem:[%s934_s21] sm:$0x3] %vm661_vm4, %v659_v37 }
 0x1aa PF: > { %s12_s13 = sadd.s32 1, %s877_s13   ;;  %s969_s9 = smov %s869_s11 }
 0x1ab   : > { %p9_p9 = scmp.ge.s32.totalorder %s12_s13, 6   ;;  %s970_s10 = smov %s873_s12 }
 0x1ac   : > { %s971_s11 = smov %s974_s14  ;;  %s972_s12 = smov %s978_s15 }
 0x1ad   :  { %11 = sbr.rel (!%p9_p9) target bundleno = 3 (0x3), region = 67 }

// kernel: _cell_forward_impl.3
= control target key start
LH: loop header
LB: loop body
LE: loop exit
PB: predicated region body
PF: predicated region fallthrough
CT: control target
= control target key end

     0   :  { %s2101_s24 = smov 0   ;;  %s2103_s25 = smov 0   ;;  %s2267_s0 = inlined_call_operand.vmem [shape: f32[2,4,256], index: 0, kind: input, shape index: {}]   ;;  %s2268_s1 = inlined_call_operand.vmem [shape: f32[2,4,256], index: 1, kind: input, shape index: {}]   ;;  %s2269_s2 = inlined_call_operand.vmem [shape: f32[8,4], index: 2, kind: input, shape index: {}]   ;;  %s2270_s3 = inlined_call_operand.vmem [shape: f32[8,4], index: 3, kind: input, shape index: {}]   ;;  %s2271_s4 = inlined_call_operand.vmem [shape: f32[8,4], index: 4, kind: input, shape index: {}]   ;;  %s2272_s5 = inlined_call_operand.vmem [shape: f32[8,1], index: 5, kind: input, shape index: {}]   ;;  %s2273_s6 = inlined_call_operand.vmem [shape: f32[8,1], index: 6, kind: input, shape index: {}]   ;;  %s2274_s7 = inlined_call_operand.vmem [shape: f32[2,8,256], index: 7, kind: output, shape index: {}]  }
   0x1   :  { %s2105_s26 = smov 0   ;;  %s2107_s27 = smov 0  }
   0x2   :  { %s2109_s28 = smov 0  }
   0x3 LB: > { %s26_s29 = sadd.s32 1, %s2048_s26  ;;  %s29_s30 = sadd.s32 1, %s2052_s27  ;;  %s2056_s28 = sphi %s2109_s28, %s17_s28   ;;  %s2052_s27 = sphi %s2107_s27, %s2278_s27   ;;  %s2048_s26 = sphi %s2105_s26, %s2277_s26   ;;  %s2044_s25 = sphi %s2103_s25, %s2276_s25   ;;  %s2040_s24 = sphi %s2101_s24, %s2275_s24  }
   0x4   : > { %p27_p0 = scmp.ge.s32.totalorder %s26_s29, 2  ;;  %p1829_p1 = scmp.ge.s32.totalorder %s2056_s28, 1 }
   0x5   : > { %p271_p2 = scmp.lt.s32.totalorder %s2056_s28, 5 }
   0x6   : > { %s2280_s29 = smov (%p27_p0, %s26_s29), 0  ;;  %s2282_s30 = smov (!%p27_p0, %s29_s30), %s2052_s27 }
   0x7   : > { %p272_p3 = pnand %p1829_p1, %p271_p2  ;;  %p31_p4 = scmp.ge.s32.totalorder %s2282_s30, 2 }
   0x8   : > { %p317_p5 = scmp.lt.s32.totalorder (!%p272_p3), %s2044_s25, 1  ;;  %p319_p6 = scmp.lt.s32.totalorder (!%p272_p3), %s2040_s24, 1  ;;  %v345_v0 = vld [vmem:[%s2271_s4] sm:$0xff] (!%p272_p3)  ;;  %v2058_v1 = vmov (!%p272_p3), 0.0   ;;  %vm2059_vm0 = vmmov (!%p272_p3), 0   ;;  %vm349_vm1 = vcmask (!%p272_p3), 31744  }
   0x9   : > { %s2284_s30 = smov (%p31_p4, %s2282_s30), 0  ;;  %275 = sbr.rel (%p272_p3) target bundleno = 299 (0x12b), region = 48 }
   0xa   : > { %1874 = vmatprep.subr.mxu0 (!%p272_p3), %v2058_v1  ;;  %1876 = vmatprep.mubr.msk.f32.mxu0 (!%p272_p3), %vm2059_vm0, %v2058_v1  ;;  %v344_v2 = vld [vmem:[%s2270_s3] sm:$0xff] (!%p272_p3)  ;;  %v351_v4 = vsel (!%p272_p3), %vm349_vm1, %v345_v0, 0  ;;  %v2060_v8 = vmov (!%p272_p3), 0   ;;  %vm353_vm2 = vcmask (!%p272_p3), 1043456  }
   0xb   : > { %v341_v3 = vld [vmem:[%s2272_s5] sm:$0xff] (!%p272_p3)  ;;  %1904 = vmatprep.subr.mxu1 (!%p272_p3), %v2058_v1  ;;  %1906 = vmatprep.mubr.msk.f32.mxu1 (!%p272_p3), %vm2059_vm0, %v2058_v1  ;;  %v804_v5 = vsel (!%p272_p3), %vm349_vm1, %v344_v2, 0  ;;  %v2154_v6 = vand.u32 (!%p272_p3), 4294901760, %v351_v4 }
   0xc   : > { %v2156_v7 = vand.u32 (!%p272_p3), 4294901760, %v804_v5  ;;  %2017 = vset.pattern.permute.xlu0 (!%p272_p3), %v2060_v8  ;;  %v342_v11 = vld [vmem:[%s2273_s6] sm:$0xff] (!%p272_p3) }
   0xd   : > { %1709 = vperm.xlu0 (!%p272_p3), %2017, %v341_v3   ;;  %v2161_v9 = vsub.f32 (!%p272_p3), %v351_v4, %v2154_v6  ;;  %v343_v37 = vld [vmem:[%s2269_s2] sm:$0xff] (!%p272_p3) }
   0xe   : > { %v876_v10 = vsub.f32 (!%p272_p3), %v804_v5, %v2156_v7  ;;  %v1256_v39 = vsel (!%p272_p3), %vm349_vm1, %v343_v37, 0 }
   0xf   : > { %v425_v12 = vand.u32 (!%p272_p3), 4294901760, %v2161_v9  ;;  %v1327_v41 = vand.u32 (!%p272_p3), 4294901760, %v1256_v39 }
  0x10   : > { %s2286_s25 = smov (!%p317_p5, %s2044_s25), 1  ;;  %s2288_s24 = smov (!%p319_p6, %s2040_s24), 1  ;;  %v877_v13 = vand.u32 4294901760, %v876_v10 }
  0x11   : > { %s1830_s14 = sshll.u32 %s2286_s25, 1  ;;  %1715 = vperm.xlu0 %2017, %v342_v11   ;;  %v426_v16 = vsub.f32 %v2161_v9, %v425_v12  ;;  %v1328_v42 = vsub.f32 %v1256_v39, %v1327_v41 }
  0x12   : > { %s2158_s15 = sadd.s32 %s1830_s14, %s2288_s24  ;;  %v878_v18 = vsub.f32 %v876_v10, %v877_v13 }
  0x13   : > { %s1831_s18 = sshll.u32 %s2158_s15, 2  ;;  %v427_v21 = vand.u32 4294901760, %v426_v16  ;;  %v1329_v43 = vand.u32 4294901760, %v1328_v42  ;;  %s1835_s9 = sshll.u32 %s2158_s15, 3 }
  0x14   : > { %s332_s21 = scalar_lea.vmem %s2268_s1, %s1831_s18  ;;  %s324_s24 = scalar_lea.vmem %s2267_s0, %s1831_s18  ;;  %v879_v22 = vand.u32 4294901760, %v878_v18 }
  0x15   : > { %v347_v14 = vld [vmem:[%s332_s21] sm:$0xf]  ;;  %v1330_v44 = vsub.f32 %v1328_v42, %v1329_v43  ;;  %s340_s12 = scalar_lea.vmem %s2274_s7, %s1835_s9 }
  0x16   : > { %v348_v15 = vmax.f32 %v347_v14, 0.0  ;;  %v807_v17 = vsel %vm353_vm2, %v347_v14, 0  ;;  %v346_v25 = vld [vmem:[%s324_s24] sm:$0xf] }
  0x17   : > { %v810_v19 = vand.u32 4294901760, %v807_v17  ;;  %v1259_v30 = vsel %vm353_vm2, %v346_v25, 0  ;;  %v1331_v45 = vand.u32 4294901760, %v1330_v44 }
  0x18   : > { %v355_v20 = vsel %vm353_vm2, %v348_v15, 0  ;;  %v1262_v33 = vand.u32 4294901760, %v1259_v30 }
  0x19   : > { %v2180_v23 = vand.u32 4294901760, %v355_v20  ;;  %1905 = vmatpush3.msra.mxu1 %v810_v19  ;;  %v887_v24 = vsub.f32 %v807_v17, %v810_v19 }
  0x1a   : > { %1907 = vmatmul.mubr.f32.vlgmr.msra.gmra.mrb[0].mxu1 %v879_v22  ;;  %1909 = vmatprep.subr.mxu1 %v2058_v1  ;;  %v1339_v35 = vsub.f32 %v1259_v30, %v1262_v33 }
  0x1b   : > { %1875 = vmatpush3.msra.mxu0 %v2180_v23  ;;  %v435_v26 = vsub.f32 %v355_v20, %v2180_v23  ;;  %v888_v27 = vand.u32 4294901760, %v887_v24  ;;  %1911 = vmatprep.mubr.msk.f32.mxu1 %vm2059_vm0, %v2058_v1 }
  0x1c   : > { %1877 = vmatmul.mubr.f32.vlgmr.msra.gmra.mrb[0].mxu0 %v427_v21  ;;  %1879 = vmatprep.subr.mxu0 %v2058_v1  ;;  %v1340_v36 = vand.u32 4294901760, %v1339_v35 }
  0x1d   : > { %v436_v28 = vand.u32 4294901760, %v435_v26  ;;  %1881 = vmatprep.mubr.msk.f32.mxu0 %vm2059_vm0, %v2058_v1  ;;  %v889_v29 = vsub.f32 %v887_v24, %v888_v27 }
  0x1e   : > { %v1341_v38 = vsub.f32 %v1339_v35, %v1340_v36 }
  0x1f   : > { %v437_v31 = vsub.f32 %v435_v26, %v436_v28  ;;  %v890_v32 = vand.u32 4294901760, %v889_v29 }
  0x20   : > { %v1342_v40 = vand.u32 4294901760, %v1341_v38 }
  0x21   : > { %v438_v34 = vand.u32 4294901760, %v437_v31  ;;  %1910 = vmatpush3.msra.mxu1 %v890_v32 }
  0x22   : > { %1912 = vmatmul.mubr.f32.vlgmr.msra.gmra.mrb[2].mxu1 %v2156_v7  ;;  %1914 = vmatprep.subr.mxu1 %v2058_v1 }
  0x23   : > { %1880 = vmatpush3.msra.mxu0 %v438_v34  ;;  %1915 = vmatpush3.msra.mxu1 %v887_v24 }
  0x24   : > { %1882 = vmatmul.mubr.f32.vlgmr.msra.gmra.mrb[0].mxu0 %v2154_v6  ;;  %1884 = vmatprep.subr.mxu0 %v2058_v1 }
  0x25   : > { %1885 = vmatpush3.msra.mxu0 %v435_v26  ;;  %1886 = vmatprep.mubr.msk.f32.mxu0 %vm2059_vm0, %v2058_v1 }
  0x26   : > { %1889 = vmatprep.subr.mxu0 %v2058_v1  ;;  %1916 = vmatprep.mubr.msk.f32.mxu1 %vm2059_vm0, %v2058_v1 }
  0x27   : > { %1917 = vmatmul.mubr.f32.vlgmr.msra.gmra.mrb[4].mxu1 %v876_v10  ;;  %1919 = vmatprep.subr.mxu1 %v2058_v1 }
  0x28   : > { %1920 = vmatpush3.msra.mxu1 %v810_v19  ;;  %1921 = vmatprep.mubr.msk.f32.mxu1 %vm2059_vm0, %v2058_v1 }
  0x29   : > { %1924 = vmatprep.subr.mxu1 %v2058_v1 }
  0x2b   : > { %1922 = vmatmul.mubr.f32.vlgmr.msra.gmra.mrb[6].mxu1 %v877_v13 }
  0x2c   : > { %1887 = vmatmul.mubr.f32.vlgmr.msra.gmra.mrb[0].mxu0 %v2161_v9  ;;  %1925 = vmatpush3.msra.mxu1 %v888_v27 }
  0x2d   : > { %1890 = vmatpush3.msra.mxu0 %v2180_v23  ;;  %1891 = vmatprep.mubr.msk.f32.mxu0 %vm2059_vm0, %v2058_v1 }
  0x2e   : > { %1894 = vmatprep.subr.mxu0 %v2058_v1  ;;  %1926 = vmatprep.mubr.msk.f32.mxu1 %vm2059_vm0, %v2058_v1 }
  0x2f   : > { %1927 = vmatmul.mubr.f32.vlgmr.msra.gmra.mrb[8].mxu1 %v2156_v7  ;;  %1929 = vmatprep.subr.mxu1 %v2058_v1 }
  0x30   : > { %1930 = vmatpush3.msra.mxu1 %v810_v19  ;;  %1931 = vmatprep.mubr.msk.f32.mxu1 %vm2059_vm0, %v2058_v1 }
  0x31   : > { %1939 = vmatprep.subr.mxu1 %v2058_v1 }
  0x33   : > { %1932 = vmatmul.mubr.f32.vlgmr.msra.gmra.mrb[10].mxu1 %v2156_v7 }
  0x34   : > { %1892 = vmatmul.mubr.f32.vlgmr.msra.gmra.mrb[0].mxu0 %v425_v12  ;;  %1940 = vmatpush3.msra.mxu1 %v1342_v40 }
  0x35   : > { %1895 = vmatpush3.msra.mxu0 %v436_v28  ;;  %1896 = vmatprep.mubr.msk.f32.mxu0 %vm2059_vm0, %v2058_v1 }
  0x36   : > { %1899 = vmatprep.subr.mxu0 %v2058_v1  ;;  %1941 = vmatprep.mubr.msk.f32.mxu1 %vm2059_vm0, %v2058_v1 }
  0x37   : > { %1942 = vmatmul.mubr.f32.vlgmr.msra.gmra.mrb[12].mxu1 %v1327_v41  ;;  %1949 = vmatprep.subr.mxu1 %v2058_v1 }
  0x38   : > { %1950 = vmatpush3.msra.mxu1 %v1262_v33  ;;  %1951 = vmatprep.mubr.msk.f32.mxu1 %vm2059_vm0, %v2058_v1 }
  0x39   : > { %1959 = vmatprep.subr.mxu1 %v2058_v1 }
  0x3b   : > { %1952 = vmatmul.mubr.f32.vlgmr.msra.gmra.mrb[14].mxu1 %v1329_v43 }
  0x3c   : > { %1897 = vmatmul.mubr.f32.vlgmr.msra.gmra.mrb[0].mxu0 %v2154_v6  ;;  %1960 = vmatpush3.msra.mxu1 %v1262_v33 }
  0x3d   : > { %1900 = vmatpush3.msra.mxu0 %v2180_v23  ;;  %1901 = vmatprep.mubr.msk.f32.mxu0 %vm2059_vm0, %v2058_v1 }
  0x3e   : > { %1934 = vmatprep.subr.mxu0 %v2058_v1  ;;  %1961 = vmatprep.mubr.msk.f32.mxu1 %vm2059_vm0, %v2058_v1 }
  0x3f   : > { %1962 = vmatmul.mubr.f32.vlgmr.msra.gmra.mrb[16].mxu1 %v1327_v41 }
  0x44   : > { %1902 = vmatmul.mubr.f32.vlgmr.msra.gmra.mrb[0].mxu0 %v2154_v6 }
  0x45   : > { %1935 = vmatpush3.msra.mxu0 %v1262_v33  ;;  %1936 = vmatprep.mubr.msk.f32.mxu0 %vm2059_vm0, %v2058_v1 }
  0x46   : > { %1944 = vmatprep.subr.mxu0 %v2058_v1 }
  0x48   : > { %1937 = vmatmul.mubr.f32.vlgmr.msra.gmra.mrb[2].mxu0 %v1331_v45 }
  0x49   : > { %1945 = vmatpush3.msra.mxu0 %v1339_v35  ;;  %1946 = vmatprep.mubr.msk.f32.mxu0 %vm2059_vm0, %v2058_v1 }
  0x4a   : > { %1954 = vmatprep.subr.mxu0 %v2058_v1 }
  0x4c   : > { %1947 = vmatmul.mubr.f32.vlgmr.msra.gmra.mrb[4].mxu0 %v1328_v42 }
  0x4d   : > { %1955 = vmatpush3.msra.mxu0 %v1340_v36  ;;  %1956 = vmatprep.mubr.msk.f32.mxu0 %vm2059_vm0, %v2058_v1 }
  0x50   : > { %1957 = vmatmul.mubr.f32.vlgmr.msra.gmra.mrb[6].mxu0 %v1327_v41 }
  0x8c   : > { %v1710_v10 = vpop.permute.xlu0 %1709 }
  0x90   : > { %v1716_v17 = vpop.permute.xlu0 %1715 }
  0xed   : > { %v881_v46 = vpop.f32.mrb[0].mxu1 }
  0xee   : > { %v1908_v47 = vpop.f32.mrb[1].mxu1 }
  0xf5   : > { %v957_v48 = vpop.f32.mrb[2].mxu1 }
  0xf6   : > { %v958_v49 = vadd.f32 %v957_v48, %v881_v46  ;;  %v1913_v50 = vpop.f32.mrb[3].mxu1 }
  0xfa   : > { %v1031_v51 = vpop.f32.mrb[4].mxu1 }
  0xfb   : > { %v1032_v52 = vadd.f32 %v1031_v51, %v958_v49  ;;  %v1918_v53 = vpop.f32.mrb[5].mxu1 }
  0xfe   : > { %v1105_v54 = vpop.f32.mrb[6].mxu1 }
  0xff   : > { %v1106_v55 = vadd.f32 %v1105_v54, %v1032_v52  ;;  %v1923_v56 = vpop.f32.mrb[7].mxu1 }
 0x102   : > { %v1179_v57 = vpop.f32.mrb[8].mxu1 }
 0x103   : > { %v1180_v58 = vadd.f32 %v1179_v57, %v1106_v55  ;;  %v1928_v59 = vpop.f32.mrb[9].mxu1 }
 0x106   : > { %v1251_v60 = vpop.f32.mrb[10].mxu1 }
 0x107   : > { %v1252_v61 = vadd.f32 %v1251_v60, %v1180_v58  ;;  %v1933_v62 = vpop.f32.mrb[11].mxu1 }
 0x10a   : > { %v1409_v63 = vpop.f32.mrb[12].mxu1 }
 0x10b   : > { %v1943_v0 = vpop.f32.mrb[13].mxu1 }
 0x10e   : > { %v1557_v1 = vpop.f32.mrb[14].mxu1 }
 0x10f   : > { %v1953_v2 = vpop.f32.mrb[15].mxu1 }
 0x112   : > { %v1703_v3 = vpop.f32.mrb[16].mxu1 }
 0x113   : > { %v1963_v4 = vpop.f32.mrb[17].mxu1 }
 0x117   : > { %v799_v5 = vpop.f32.mrb[0].mxu0 }
 0x118   : > { %v1903_v6 = vpop.f32.mrb[1].mxu0  ;;  %v1712_v15 = vmul.f32 %v1710_v10, %v799_v5 }
 0x11a   : > { %v1718_v21 = vadd.f32 %v1716_v17, %v1712_v15 }
 0x11b   : > { %v1333_v7 = vpop.f32.mrb[2].mxu0 }
 0x11c   : > { %v1334_v8 = vadd.f32 %v1333_v7, %v1252_v61  ;;  %v1938_v9 = vpop.f32.mrb[3].mxu0 }
 0x11e   : > { %v1410_v11 = vadd.f32 %v1409_v63, %v1334_v8 }
 0x11f   : > { %v1483_v12 = vpop.f32.mrb[4].mxu0 }
 0x120   : > { %v1484_v13 = vadd.f32 %v1483_v12, %v1410_v11  ;;  %v1948_v14 = vpop.f32.mrb[5].mxu0 }
 0x122   : > { %v1558_v16 = vadd.f32 %v1557_v1, %v1484_v13 }
 0x123   : > { %v1631_v18 = vpop.f32.mrb[6].mxu0 }
 0x124   : > { %v1632_v19 = vadd.f32 %v1631_v18, %v1558_v16  ;;  %v1958_v20 = vpop.f32.mrb[7].mxu0 }
 0x126   : > { %v1704_v22 = vadd.f32 %v1703_v3, %v1632_v19 }
 0x128   : > { %v1719_v23 = vadd.f32 %v1718_v21, %v1704_v22 }
 0x12a   : > { %1720 = vst [vmem:[%s340_s12] sm:$0xff] %v1719_v23 }
 0x12b PF: > { %s17_s28 = sadd.s32 1, %s2056_s28   ;;  %s2275_s24 = smov %s2048_s26 }
 0x12c   : > { %p14_p7 = scmp.ge.s32.totalorder %s17_s28, 6   ;;  %s2276_s25 = smov %s2052_s27 }
 0x12d   : > { %s2277_s26 = smov %s2280_s29  ;;  %s2278_s27 = smov %s2284_s30 }
 0x12e   :  { %16 = sbr.rel (!%p14_p7) target bundleno = 3 (0x3), region = 81 }

</bundles_post_ra>
